<compile_context>
chip_gen: v5e
topology: v5e:2x2
jax: 0.10.0
libtpu: 0.0.40
codegen_flags: <defaults>
</compile_context>

<pallas_src>
import functools

import jax
import jax.numpy as jnp
from jax.experimental import pallas as pl
from jax.experimental.pallas import tpu as pltpu


def _round_up(x, m):
    return ((x + m - 1) // m) * m


def _choose_tile_b(B, S, D, itemsize, requested):
    """Batch tile: multiple of 8 sublanes, capped so the gather scratch stays small."""
    if requested is not None:
        return _round_up(int(requested), 8)
    tile_b = min(_round_up(B, 8), 128)
    budget = 8 * 1024 * 1024          # keep per-tile gather scratch under ~8 MiB
    while tile_b > 8 and tile_b * S * D * itemsize > budget:
        tile_b -= 8
    return tile_b


def _r2v_classifier_kernel(tok_ref, table_hbm, attn_w_ref, out_w_ref, out_b_ref,
                           logits_ref, emb_buf, dma_sem, *, tile_b, seq, max_inflight):
    """One grid step processes one batch tile.

    tok_ref    : SMEM (B_pad*S,) int32 -- scalar-prefetched token ids (flattened)
    table_hbm  : HBM  (V, D)           -- embedding table, raw ref (memory_space=ANY)
    attn_w_ref : VMEM (1, D)           -- attention weight (row vector)
    out_w_ref  : VMEM (D, C_pad)       -- output weight, pre-transposed + zero-padded
    out_b_ref  : VMEM (1, C_pad)       -- output bias, zero-padded
    logits_ref : VMEM (tile_b, C_pad)  -- output tile
    emb_buf    : VMEM (tile_b*S, D)    -- gathered embedding rows (scratch)
    dma_sem    : DMA semaphore (1,)
    """
    n = tile_b * seq
    base = pl.program_id(0) * n
    lag = min(n, max_inflight)          # bound on concurrently in-flight row DMAs

    # ---- In-kernel embedding gather: one row DMA per token.  A single counted
    # ---- semaphore is shared by all copies; every copy has identical size, so each
    # ---- wait retires exactly one row.  Sliding window keeps `lag` copies in flight.
    @pl.loop(0, n)
    def _issue(idx):
        @pl.when(idx >= lag)
        def _():
            pltpu.make_async_copy(table_hbm.at[0], emb_buf.at[0], dma_sem.at[0]).wait()
        tok = tok_ref[base + idx]
        pltpu.make_async_copy(table_hbm.at[tok], emb_buf.at[idx], dma_sem.at[0]).start()

    @pl.loop(0, lag)
    def _drain(_):
        pltpu.make_async_copy(table_hbm.at[0], emb_buf.at[0], dma_sem.at[0]).wait()

    # ---- Attention + output head (all f32 on-chip). ----
    emb = emb_buf[...].astype(jnp.float32).reshape(tile_b, seq, -1)   # (tile_b, S, D)
    w_a = attn_w_ref[...].astype(jnp.float32)                         # (1, D)

    # scores = x @ w_attn, kept lane-dense as (tile_b, S) (no trailing size-1 dim)
    scores = jnp.sum(emb * w_a[None, :, :], axis=-1)                  # (tile_b, S)

    # softmax over the sequence axis (PyTorch dim=1), max-stabilized
    m = jnp.max(scores, axis=-1, keepdims=True)                       # (tile_b, 1)
    e = jnp.exp(scores - m)                                           # (tile_b, S)
    denom = jnp.sum(e, axis=-1, keepdims=True)                        # (tile_b, 1)

    # attention-weighted pooling; fold 1/denom into the pooled (tile_b, D) tensor
    pooled = jnp.sum(emb * e[:, :, None], axis=1)                     # (tile_b, D)
    pooled = pooled * pl.reciprocal(denom, approx=True)

    # output linear layer on the MXU: (tile_b, D) @ (D, C_pad) + (1, C_pad)
    logits = jnp.dot(pooled, out_w_ref[...].astype(jnp.float32),
                     preferred_element_type=jnp.float32)
    logits = logits + out_b_ref[...].astype(jnp.float32)
    logits_ref[...] = logits.astype(logits_ref.dtype)


@functools.partial(jax.jit, static_argnames=("tile_b", "max_inflight"))
def region2vec_classifier_forward(tokens, emb_table, attn_w, out_w, out_b,
                                  *, tile_b=None, max_inflight=64):
    """Fused Region2Vec embedding lookup + attention pooling + linear head.

    tokens    : (B, S) int32 region-token ids
    emb_table : (V, D) Region2Vec embedding table (f32 or bf16)
    attn_w    : (D, 1) Attention weight (PyTorch layout)
    out_w     : (C, D) nn.Linear weight (PyTorch layout)
    out_b     : (C,)   nn.Linear bias
    returns   : (B, C) f32 logits
    """
    B, S = tokens.shape
    V, D = emb_table.shape
    C = out_w.shape[0]
    emb_itemsize = jnp.dtype(emb_table.dtype).itemsize

    # Batch tile (multiple of 8 sublanes); padded rows reuse token id 0 and are
    # sliced off after the call.
    tile_b = _choose_tile_b(B, S, D, emb_itemsize, tile_b)
    b_pad = _round_up(B, tile_b)

    # Lane-dense output: pad the class dim to a multiple of 128 (zero columns are
    # numerically inert and sliced off after the call).
    c_pad = _round_up(C, 128)

    tokens_flat = jnp.pad(tokens.astype(jnp.int32),
                          ((0, b_pad - B), (0, 0))).reshape(-1)        # (b_pad*S,)
    attn_w_row = attn_w.reshape(1, D)                                  # (1, D)
    out_w_t = jnp.pad(out_w.T, ((0, 0), (0, c_pad - C)))               # (D, c_pad)
    out_b_p = jnp.pad(out_b.reshape(1, C), ((0, 0), (0, c_pad - C)))   # (1, c_pad)

    grid = (b_pad // tile_b,)

    kernel = functools.partial(_r2v_classifier_kernel,
                               tile_b=tile_b, seq=S, max_inflight=max_inflight)

    # VMEM budget: gather scratch + double-buffered output tile + resident weights.
    vmem_need = (tile_b * S * D * emb_itemsize
                 + 2 * tile_b * c_pad * 4
                 + 2 * (D * c_pad + D + c_pad) * 4
                 + (2 << 20))                                          # headroom
    vmem_limit = int(min(max(vmem_need, 32 << 20), 48 << 20))

    cost = pl.CostEstimate(
        flops=4 * b_pad * S * D + 2 * b_pad * D * c_pad,
        transcendentals=b_pad * S + b_pad,
        bytes_accessed=(b_pad * S * (D * emb_itemsize + 4)
                        + (D * c_pad + D + c_pad) * 4
                        + b_pad * c_pad * 4),
    )

    logits_padded = pl.pallas_call(
        kernel,
        out_shape=jax.ShapeDtypeStruct((b_pad, c_pad), jnp.float32),
        grid_spec=pltpu.PrefetchScalarGridSpec(
            num_scalar_prefetch=1,                         # token ids -> SMEM
            grid=grid,
            in_specs=[
                pl.BlockSpec(memory_space=pl.ANY),         # embedding table stays in HBM
                pl.BlockSpec((1, D), lambda i, tok: (0, 0)),
                pl.BlockSpec((D, c_pad), lambda i, tok: (0, 0)),
                pl.BlockSpec((1, c_pad), lambda i, tok: (0, 0)),
            ],
            out_specs=pl.BlockSpec((tile_b, c_pad), lambda i, tok: (i, 0)),
            scratch_shapes=[
                pltpu.VMEM((tile_b * S, D), emb_table.dtype),
                pltpu.SemaphoreType.DMA((1,)),
            ],
        ),
        compiler_params=pltpu.CompilerParams(
            dimension_semantics=("parallel",),             # batch tiles -> both TCs on v7x
            vmem_limit_bytes=vmem_limit,
        ),
        cost_estimate=cost,
    )(tokens_flat, emb_table, attn_w_row, out_w_t, out_b_p)

    return logits_padded[:B, :C]


def reference_forward(tokens, emb_table, attn_w, out_w, out_b):
    emb = emb_table[tokens]                         # (B, S, D)
    scores = emb @ attn_w                           # (B, S, 1)
    w = jax.nn.softmax(scores, axis=1)
    pooled = jnp.sum(emb * w, axis=1)               # (B, D)
    return pooled @ out_w.T + out_b                 # (B, C)


if __name__ == "__main__":
    # Small synthetic config: vocab=100, embedding_dim=32, num_classes=4, batch=2, seq=8
    V, D, C = 100, 32, 4
    B, S = 2, 8

    key = jax.random.PRNGKey(0)
    k1, k2, k3, k4, k5 = jax.random.split(key, 5)

    emb_table = jax.random.normal(k1, (V, D), dtype=jnp.float32)
    attn_w = jax.random.normal(k2, (D, 1), dtype=jnp.float32) / jnp.sqrt(D)   # Attention param (D, 1)
    out_w = jax.random.normal(k3, (C, D), dtype=jnp.float32) / jnp.sqrt(D)    # nn.Linear weight (C, D)
    out_b = 0.01 * jax.random.normal(k4, (C,), dtype=jnp.float32)             # nn.Linear bias (C,)
    tokens = jax.random.randint(k5, (B, S), 0, V, dtype=jnp.int32)

    logits = region2vec_classifier_forward(tokens, emb_table, attn_w, out_w, out_b)
    logits = jax.block_until_ready(logits)

    ref = reference_forward(tokens, emb_table, attn_w, out_w, out_b)
    assert logits.shape == (B, C)
    # tolerance accounts for the approximate EUP reciprocal used for the softmax norm
    assert jnp.allclose(logits, ref, atol=2e-3, rtol=2e-3), "mismatch vs reference"

    print("KERNEL_OK")
</pallas_src>

<mosaic_0001>
module attributes {stable_mosaic.version = 11 : i64} {
  func.func @_r2v_classifier_kernel(%arg0: i32, %arg1: memref<64xi32, #tpu.memory_space<smem>>, %arg2: memref<100x32xf32, #tpu.memory_space<any>>, %arg3: memref<1x32xf32, #tpu.memory_space<vmem>>, %arg4: memref<32x128xf32, #tpu.memory_space<vmem>>, %arg5: memref<1x128xf32, #tpu.memory_space<vmem>>, %arg6: memref<8x128xf32, #tpu.memory_space<vmem>>, %arg7: memref<64x32xf32, #tpu.memory_space<vmem>>, %arg8: memref<1x!tpu.dma_semaphore, #tpu.memory_space<semaphore_mem>>) attributes {dimension_semantics = [#tpu.dimension_semantics<parallel>], iteration_bounds = array<i64: 1>, scalar_prefetch = 1 : i64, scratch_operands = 2 : i64, tpu.core_type = #tpu.core_type<tc>, window_params = [{}, {pipeline_mode = #tpu.pipeline_mode<synchronous>, transform_indices = @transform_1, window_bounds = array<i64: 1, 32>}, {pipeline_mode = #tpu.pipeline_mode<synchronous>, transform_indices = @transform_2, window_bounds = array<i64: 32, 128>}, {pipeline_mode = #tpu.pipeline_mode<synchronous>, transform_indices = @transform_3, window_bounds = array<i64: 1, 128>}, {transform_indices = @transform_4, window_bounds = array<i64: 8, 128>}]} {
    %c64_i32 = arith.constant 64 : i32
    %0 = arith.muli %arg0, %c64_i32 : i32
    %c0_i32 = arith.constant 0 : i32
    %c64_i32_0 = arith.constant 64 : i32
    %1 = arith.addi %c0_i32, %c64_i32_0 : i32
    %c1_i32 = arith.constant 1 : i32
    scf.for %arg9 = %c0_i32 to %1 step %c1_i32  : i32 {
      %c1_i32_18 = arith.constant 1 : i32
      %30 = arith.muli %arg9, %c1_i32_18 : i32
      %c0_i32_19 = arith.constant 0 : i32
      %31 = arith.addi %c0_i32_19, %30 : i32
      %c64_i32_20 = arith.constant 64 : i32
      %32 = arith.cmpi sge, %31, %c64_i32_20 : i32
      %33 = arith.extui %32 : i1 to i32
      %c0_i32_21 = arith.constant 0 : i32
      %34 = arith.cmpi ne, %33, %c0_i32_21 : i32
      scf.if %34 {
        %c0_i32_25 = arith.constant 0 : i32
        %c0_i32_26 = arith.constant 0 : i32
        %c0_i32_27 = arith.constant 0 : i32
        %c0_i32_28 = arith.constant 0 : i32
        %44 = tpu.memref_slice %arg2[%c0_i32_25, %c0_i32_28] : memref<100x32xf32, #tpu.memory_space<any>> -> memref<1x32xf32, #tpu.memory_space<any>>
        %45 = tpu.memref_squeeze %44 : memref<1x32xf32, #tpu.memory_space<any>> -> memref<32xf32, #tpu.memory_space<any>>
        %c0_i32_29 = arith.constant 0 : i32
        %46 = tpu.memref_slice %arg7[%c0_i32_26, %c0_i32_29] : memref<64x32xf32, #tpu.memory_space<vmem>> -> memref<1x32xf32, #tpu.memory_space<vmem>>
        %47 = tpu.memref_squeeze %46 : memref<1x32xf32, #tpu.memory_space<vmem>> -> memref<32xf32, #tpu.memory_space<vmem>>
        %48 = tpu.memref_slice %arg8[%c0_i32_27] : memref<1x!tpu.dma_semaphore, #tpu.memory_space<semaphore_mem>> -> memref<1x!tpu.dma_semaphore, #tpu.memory_space<semaphore_mem>>
        %49 = tpu.memref_squeeze %48 : memref<1x!tpu.dma_semaphore, #tpu.memory_space<semaphore_mem>> -> memref<!tpu.dma_semaphore, #tpu.memory_space<semaphore_mem>>
        tpu.wait_dma2 semaphore(%49 : memref<!tpu.dma_semaphore, #tpu.memory_space<semaphore_mem>>) src(%45 : memref<32xf32, #tpu.memory_space<any>>) dst(%47 : memref<32xf32, #tpu.memory_space<vmem>>)
      } else {
      }
      %35 = arith.addi %0, %31 : i32
      %36 = arith.index_cast %35 : i32 to index
      %37 = memref.load %arg1[%36] : memref<64xi32, #tpu.memory_space<smem>>
      %c0_i32_22 = arith.constant 0 : i32
      %c0_i32_23 = arith.constant 0 : i32
      %38 = tpu.memref_slice %arg2[%37, %c0_i32_23] : memref<100x32xf32, #tpu.memory_space<any>> -> memref<1x32xf32, #tpu.memory_space<any>>
      %39 = tpu.memref_squeeze %38 : memref<1x32xf32, #tpu.memory_space<any>> -> memref<32xf32, #tpu.memory_space<any>>
      %c0_i32_24 = arith.constant 0 : i32
      %40 = tpu.memref_slice %arg7[%31, %c0_i32_24] : memref<64x32xf32, #tpu.memory_space<vmem>> -> memref<1x32xf32, #tpu.memory_space<vmem>>
      %41 = tpu.memref_squeeze %40 : memref<1x32xf32, #tpu.memory_space<vmem>> -> memref<32xf32, #tpu.memory_space<vmem>>
      %42 = tpu.memref_slice %arg8[%c0_i32_22] : memref<1x!tpu.dma_semaphore, #tpu.memory_space<semaphore_mem>> -> memref<1x!tpu.dma_semaphore, #tpu.memory_space<semaphore_mem>>
      %43 = tpu.memref_squeeze %42 : memref<1x!tpu.dma_semaphore, #tpu.memory_space<semaphore_mem>> -> memref<!tpu.dma_semaphore, #tpu.memory_space<semaphore_mem>>
      tpu.enqueue_dma source(%39 : memref<32xf32, #tpu.memory_space<any>>) target(%41 : memref<32xf32, #tpu.memory_space<vmem>>) target_semaphore(%43 : memref<!tpu.dma_semaphore, #tpu.memory_space<semaphore_mem>>)
    }
    %c64_i32_1 = arith.constant 64 : i32
    %c0_i32_2 = arith.constant 0 : i32
    %c64_i32_3 = arith.constant 64 : i32
    %2 = arith.addi %c0_i32_2, %c64_i32_3 : i32
    %c1_i32_4 = arith.constant 1 : i32
    scf.for %arg9 = %c0_i32_2 to %2 step %c1_i32_4  : i32 {
      %c0_i32_18 = arith.constant 0 : i32
      %c0_i32_19 = arith.constant 0 : i32
      %c0_i32_20 = arith.constant 0 : i32
      %c0_i32_21 = arith.constant 0 : i32
      %30 = tpu.memref_slice %arg2[%c0_i32_18, %c0_i32_21] : memref<100x32xf32, #tpu.memory_space<any>> -> memref<1x32xf32, #tpu.memory_space<any>>
      %31 = tpu.memref_squeeze %30 : memref<1x32xf32, #tpu.memory_space<any>> -> memref<32xf32, #tpu.memory_space<any>>
      %c0_i32_22 = arith.constant 0 : i32
      %32 = tpu.memref_slice %arg7[%c0_i32_19, %c0_i32_22] : memref<64x32xf32, #tpu.memory_space<vmem>> -> memref<1x32xf32, #tpu.memory_space<vmem>>
      %33 = tpu.memref_squeeze %32 : memref<1x32xf32, #tpu.memory_space<vmem>> -> memref<32xf32, #tpu.memory_space<vmem>>
      %34 = tpu.memref_slice %arg8[%c0_i32_20] : memref<1x!tpu.dma_semaphore, #tpu.memory_space<semaphore_mem>> -> memref<1x!tpu.dma_semaphore, #tpu.memory_space<semaphore_mem>>
      %35 = tpu.memref_squeeze %34 : memref<1x!tpu.dma_semaphore, #tpu.memory_space<semaphore_mem>> -> memref<!tpu.dma_semaphore, #tpu.memory_space<semaphore_mem>>
      tpu.wait_dma2 semaphore(%35 : memref<!tpu.dma_semaphore, #tpu.memory_space<semaphore_mem>>) src(%31 : memref<32xf32, #tpu.memory_space<any>>) dst(%33 : memref<32xf32, #tpu.memory_space<vmem>>)
    }
    %c0 = arith.constant 0 : index
    %c0_5 = arith.constant 0 : index
    %3 = vector.load %arg7[%c0, %c0_5] : memref<64x32xf32, #tpu.memory_space<vmem>>, vector<64x32xf32>
    %4 = vector.shape_cast %3 : vector<64x32xf32> to vector<8x8x32xf32>
    %c0_6 = arith.constant 0 : index
    %c0_7 = arith.constant 0 : index
    %5 = vector.load %arg3[%c0_6, %c0_7] : memref<1x32xf32, #tpu.memory_space<vmem>>, vector<1x32xf32>
    %6 = vector.shape_cast %5 : vector<1x32xf32> to vector<1x1x32xf32>
    %7 = vector.broadcast %6 : vector<1x1x32xf32> to vector<8x8x32xf32>
    %8 = arith.mulf %4, %7 : vector<8x8x32xf32>
    %cst = arith.constant dense<0.000000e+00> : vector<8x8xf32>
    %9 = vector.multi_reduction <add>, %8, %cst [2] : vector<8x8x32xf32> to vector<8x8xf32>
    %cst_8 = arith.constant dense<0xFF800000> : vector<8xf32>
    %10 = vector.multi_reduction <maximumf>, %9, %cst_8 [1] : vector<8x8xf32> to vector<8xf32>
    %11 = vector.shape_cast %10 : vector<8xf32> to vector<8x1xf32>
    %12 = vector.broadcast %11 : vector<8x1xf32> to vector<8x8xf32>
    %13 = arith.subf %9, %12 : vector<8x8xf32>
    %14 = math.exp %13 : vector<8x8xf32>
    %cst_9 = arith.constant dense<0.000000e+00> : vector<8xf32>
    %15 = vector.multi_reduction <add>, %14, %cst_9 [1] : vector<8x8xf32> to vector<8xf32>
    %16 = vector.shape_cast %15 : vector<8xf32> to vector<8x1xf32>
    %17 = vector.shape_cast %14 : vector<8x8xf32> to vector<8x8x1xf32>
    %18 = vector.broadcast %17 : vector<8x8x1xf32> to vector<8x8x32xf32>
    %19 = arith.mulf %4, %18 : vector<8x8x32xf32>
    %cst_10 = arith.constant dense<0.000000e+00> : vector<8x32xf32>
    %20 = vector.multi_reduction <add>, %19, %cst_10 [1] : vector<8x8x32xf32> to vector<8x32xf32>
    %21 = tpu.reciprocal %16 {approx = true} : vector<8x1xf32> -> vector<8x1xf32>
    %22 = vector.broadcast %21 : vector<8x1xf32> to vector<8x32xf32>
    %23 = arith.mulf %20, %22 : vector<8x32xf32>
    %c0_11 = arith.constant 0 : index
    %c0_12 = arith.constant 0 : index
    %24 = vector.load %arg4[%c0_11, %c0_12] : memref<32x128xf32, #tpu.memory_space<vmem>>, vector<32x128xf32>
    %cst_13 = arith.constant dense<0.000000e+00> : vector<8x128xf32>
    %25 = tpu.matmul %23, %24, %cst_13 {dimension_numbers = #tpu.dot_dimension_numbers<[1], [0], [0], [1], [0, 0, 1, 1], [], []>} : vector<8x32xf32>, vector<32x128xf32>, vector<8x128xf32> -> vector<8x128xf32>
    %c0_14 = arith.constant 0 : index
    %c0_15 = arith.constant 0 : index
    %26 = vector.load %arg5[%c0_14, %c0_15] : memref<1x128xf32, #tpu.memory_space<vmem>>, vector<1x128xf32>
    %27 = vector.broadcast %26 : vector<1x128xf32> to vector<8x128xf32>
    %28 = arith.addf %25, %27 : vector<8x128xf32>
    %c0_16 = arith.constant 0 : index
    %c0_17 = arith.constant 0 : index
    %29 = vector.load %arg6[%c0_16, %c0_17] : memref<8x128xf32, #tpu.memory_space<vmem>>, vector<8x128xf32>
    tpu.vector_store %arg6[%c0_16, %c0_17], %28 {strides = array<i32>} : memref<8x128xf32, #tpu.memory_space<vmem>>, vector<8x128xf32>,
    return
  }
  func.func @transform_1(%arg0: i32, %arg1: memref<64xi32, #tpu.memory_space<smem>>) -> (i32, i32) {
    %c0_i32 = arith.constant 0 : i32
    %c0_i32_0 = arith.constant 0 : i32
    %c0_i32_1 = arith.constant 0 : i32
    return %c0_i32, %c0_i32_0 : i32, i32
  }
  func.func @transform_2(%arg0: i32, %arg1: memref<64xi32, #tpu.memory_space<smem>>) -> (i32, i32) {
    %c0_i32 = arith.constant 0 : i32
    %c0_i32_0 = arith.constant 0 : i32
    %c0_i32_1 = arith.constant 0 : i32
    return %c0_i32, %c0_i32_0 : i32, i32
  }
  func.func @transform_3(%arg0: i32, %arg1: memref<64xi32, #tpu.memory_space<smem>>) -> (i32, i32) {
    %c0_i32 = arith.constant 0 : i32
    %c0_i32_0 = arith.constant 0 : i32
    %c0_i32_1 = arith.constant 0 : i32
    return %c0_i32, %c0_i32_0 : i32, i32
  }
  func.func @transform_4(%arg0: i32, %arg1: memref<64xi32, #tpu.memory_space<smem>>) -> (i32, i32) {
    %c0_i32 = arith.constant 0 : i32
    %c0_i32_0 = arith.constant 0 : i32
    return %arg0, %c0_i32 : i32, i32
  }
}

</mosaic_0001>

<bundles_post_ra>
// kernel: region2vec_classifier_forward.1
= control target key start
LH: loop header
LB: loop body
LE: loop exit
PB: predicated region body
PF: predicated region fallthrough
CT: control target
= control target key end

     0   :  { %s516_s21 = smov [#allocation5]   ;;  %s665_s0 = inlined_call_operand.vmem [shape: s32[64], index: 0, kind: input, shape index: {}]   ;;  %s666_s1 = inlined_call_operand.vmem [shape: f32[100,32], index: 1, kind: input, shape index: {}]   ;;  %s667_s2 = inlined_call_operand.vmem [shape: f32[1,32], index: 2, kind: input, shape index: {}]   ;;  %s668_s3 = inlined_call_operand.vmem [shape: f32[32,128], index: 3, kind: input, shape index: {}]   ;;  %s669_s4 = inlined_call_operand.vmem [shape: f32[1,128], index: 4, kind: input, shape index: {}]   ;;  %s670_s5 = inlined_call_operand.vmem [shape: f32[8,128], index: 5, kind: output, shape index: {}]  }
   0x1   :  { %s11_s20 = sshll.u32 %s665_s0, 4  ;;  %s12_s20 = int_to_ptr.vmem [resolvable:$true] %s11_s20 }
   0x2   :  { %14 = dma.vmem_to_smem %s12_s20, 16, %s516_s21, [#allocation4] }
   0x3   :  { %500 = dma.done.wait [#allocation4], 16 }
   0x4   :  { %501 = vsyncadd [#allocation4], 4294967280 }
   0x5   :  { %17 = sfence }
   0x6   :  { %s508_s22 = smov 0  }
   0x7 LB: > { %p438_p0 = scmp.ge.s32.totalorder %s510_s22, 64  ;;  %s510_s22 = sphi %s508_s22, %s30_s22  }
   0x9   : > { %503 = dma.done.wait (%p438_p0), [#allocation3], 16 }
   0xa   : > { %505 = vsyncadd (%p438_p0), [#allocation3], 4294967280  ;;  %s38_s23 = sld [smem:[#allocation5 + %s510_s22]]  ;;  %s40_s0 = scalar_lea.vmem [#allocation2], %s510_s22 }
  0x10   : > { %s39_s26 = scalar_lea.vmem %s666_s1, %s38_s23 }
  0x11   : > { %v55_v0 = vld [vmem:[%s39_s26] sm:$0x1] }
  0x12   : > { %56 = vst [vmem:[%s40_s0] sm:$0x1] %v55_v0 }
  0x13   : > { %74 = vsyncadd [#allocation3], 16  ;;  %s30_s22 = sadd.s32 1, %s510_s22  }
  0x14   : > { %p27_p1 = scmp.ge.s32.totalorder %s30_s22, 64  }
  0x15   :  { %s512_s27 = smov (%p27_p1), 0  }
  0x16   :  { %29 = sbr.rel (!%p27_p1) target bundleno = 7 (0x7), region = 86 }
  0x1b LB: > { %506 = dma.done.wait [#allocation3], 16  ;;  %s514_s27 = sphi %s512_s27, %s80_s27  }
  0x1c   : > { %507 = vsyncadd [#allocation3], 4294967280  ;;  %s80_s27 = sadd.s32 1, %s514_s27  }
  0x1d   : > { %p77_p2 = scmp.ge.s32.totalorder %s80_s27, 64  }
  0x1e   :  { %v554_v1 = vld [vmem:[#allocation2] sm:$0xff] (%p77_p2)  ;;  %vm103_vm0 = vcmask (%p77_p2), 261120   ;;  %v559_v3 = vld [vmem:[#allocation2 + $0x10] sm:$0xff] (%p77_p2)  ;;  %v566_v8 = vld [vmem:[#allocation2 + $0x8] sm:$0xff] (%p77_p2)  ;;  %v136_v28 = vlaneseq (%p77_p2)  ;;  %vm146_vm1 = vcmask (%p77_p2), 1041409   ;;  %vm148_vm2 = vcmask (%p77_p2), 1042434  }
  0x1f   :  { %79 = sbr.rel (!%p77_p2) target bundleno = 27 (0x1b), region = 97  ;;  %v460_v2 = vld [vmem:[%s667_s2] ss:$0 sm:$0xff] (%p77_p2)  ;;  %v568_v9 = vld [vmem:[#allocation2 + $0x18] sm:$0xff] (%p77_p2)  ;;  %v573_v13 = vld [vmem:[#allocation2 + $0x28] sm:$0xff] (%p77_p2)  ;;  %vm150_vm3 = vcmask (%p77_p2), 1043459  }
  0x20   :  { %v561_v4 = vld [vmem:[#allocation2 + $0x20] sm:$0xff] (%p77_p2)  ;;  %v95_v5 = vmul.f32 (%p77_p2), %v460_v2, %v554_v1  ;;  %v97_v6 = vmul.f32 (%p77_p2), %v460_v2, %v559_v3  ;;  %v96_v14 = vmul.f32 (%p77_p2), %v460_v2, %v566_v8  ;;  %v98_v15 = vmul.f32 (%p77_p2), %v460_v2, %v568_v9  ;;  %v581_v20 = vld [vmem:[#allocation2 + $0x30] sm:$0xff] (%p77_p2)  ;;  %v583_v21 = vld [vmem:[#allocation2 + $0x38] sm:$0xff] (%p77_p2) }
  0x21   :  { %v99_v7 = vmul.f32 (%p77_p2), %v460_v2, %v561_v4  ;;  %v100_v16 = vmul.f32 (%p77_p2), %v460_v2, %v573_v13  ;;  %v101_v22 = vmul.f32 (%p77_p2), %v460_v2, %v581_v20  ;;  %v102_v23 = vmul.f32 (%p77_p2), %v460_v2, %v583_v21 }
  0x22   :  { %v104_v10 = vsel (%p77_p2), %vm103_vm0, %v95_v5, 0.0  ;;  %v110_v11 = vsel (%p77_p2), %vm103_vm0, %v97_v6, 0.0  ;;  %v107_v17 = vsel (%p77_p2), %vm103_vm0, %v96_v14, 0.0  ;;  %v113_v18 = vsel (%p77_p2), %vm103_vm0, %v98_v15, 0.0 }
  0x23   :  { %v116_v12 = vsel (%p77_p2), %vm103_vm0, %v99_v7, 0.0  ;;  %105 = vadd.xlane.f32.xlu0 (%p77_p2), %v104_v10  ;;  %111 = vadd.xlane.f32.xlu1 (%p77_p2), %v110_v11  ;;  %v119_v19 = vsel (%p77_p2), %vm103_vm0, %v100_v16, 0.0  ;;  %v122_v24 = vsel (%p77_p2), %vm103_vm0, %v101_v22, 0.0  ;;  %v125_v25 = vsel (%p77_p2), %vm103_vm0, %v102_v23, 0.0 }
  0x24   :  { %117 = vadd.xlane.f32.xlu2 %v116_v12  ;;  %v589_v30 = vand.u32 127, %v136_v28  ;;  %vm152_vm4 = vcmask 1044484   ;;  %vm154_vm5 = vcmask 1045509   ;;  %vm156_vm6 = vcmask 1046534  }
  0x25   :  { %vm158_vm7 = vcmask 1047559   ;;  %vm161_vm8 = vcmask 64512   ;;  %v517_v52 = vmov 0  }
  0x26   :  { %459 = vset.pattern.permute.xlu2 %v517_v52  ;;  %458 = vset.pattern.permute.xlu1 %v517_v52 }
  0x27   :  { %457 = vset.pattern.permute.xlu0 %v517_v52 }
  0x2b   :  { %108 = vadd.xlane.f32.xlu0 %v107_v17  ;;  %114 = vadd.xlane.f32.xlu1 %v113_v18 }
  0x2c   :  { %120 = vadd.xlane.f32.xlu2 %v119_v19 }
  0x33   :  { %123 = vadd.xlane.f32.xlu0 %v122_v24  ;;  %126 = vadd.xlane.f32.xlu1 %v125_v25 }
  0x96   :  { %v106_v26 = vpop.xlane.xlu0 %105  ;;  %v112_v27 = vpop.xlane.xlu1 %111 }
  0x97   :  { %v118_v29 = vpop.xlane.xlu2 %117  ;;  %v138_v33 = vperm.slane %v106_v26, %v589_v30  ;;  %v140_v36 = vperm.slane %v112_v27, %v589_v30 }
  0x98   :  { %v142_v40 = vperm.slane %v118_v29, %v589_v30 }
  0x9e   :  { %v109_v31 = vpop.xlane.xlu0 %108  ;;  %v115_v32 = vpop.xlane.xlu1 %114 }
  0x9f   :  { %v139_v34 = vperm.slane %v109_v31, %v589_v30  ;;  %v141_v35 = vperm.slane %v115_v32, %v589_v30  ;;  %v121_v38 = vpop.xlane.xlu2 %120 }
  0xa0   :  { %v143_v42 = vperm.slane %v121_v38, %v589_v30 }
  0xa1   :  { %v147_v37 = vsel %vm146_vm1, %v139_v34, %v138_v33 }
  0xa2   :  { %v149_v39 = vsel %vm148_vm2, %v140_v36, %v147_v37 }
  0xa3   :  { %v151_v41 = vsel %vm150_vm3, %v141_v35, %v149_v39 }
  0xa4   :  { %v153_v43 = vsel %vm152_vm4, %v142_v40, %v151_v41 }
  0xa5   :  { %v155_v48 = vsel %vm154_vm5, %v143_v42, %v153_v43 }
  0xa6   :  { %v124_v44 = vpop.xlane.xlu0 %123  ;;  %v127_v45 = vpop.xlane.xlu1 %126 }
  0xa7   :  { %v144_v46 = vperm.slane %v124_v44, %v589_v30  ;;  %v145_v47 = vperm.slane %v127_v45, %v589_v30 }
  0xa9   :  { %v157_v49 = vsel %vm156_vm6, %v144_v46, %v155_v48 }
  0xaa   :  { %v159_v50 = vsel %vm158_vm7, %v145_v47, %v157_v49 }
  0xab   :  { %v162_v51 = vsel %vm161_vm8, %v159_v50, -inf }
  0xac   :  { %163 = vmax.xlane.f32.xlu2 %v162_v51 }
 0x11f   :  { %v164_v53 = vpop.xlane.xlu2 %163 }
 0x120   :  { %v168_v54 = vperm.slane %v164_v53, 2  ;;  %v167_v55 = vperm.slane %v164_v53, 1  ;;  %v166_v56 = vperm.slane %v164_v53, 0  ;;  %v169_v60 = vperm.slane %v164_v53, 3 }
 0x121   :  { %v170_v61 = vperm.slane %v164_v53, 4  ;;  %v173_v62 = vperm.slane %v164_v53, 7  ;;  %v171_v11 = vperm.slane %v164_v53, 5  ;;  %v172_v14 = vperm.slane %v164_v53, 6 }
 0x122   :  { %v184_v57 = vsub.f32 %v112_v27, %v168_v54  ;;  %v183_v58 = vsub.f32 %v109_v31, %v167_v55  ;;  %v182_v59 = vsub.f32 %v106_v26, %v166_v56  ;;  %v185_v5 = vsub.f32 %v115_v32, %v169_v60  ;;  %v357_v55 = vld [vmem:[%s668_s3 + $0x18] sm:$0xff]  ;;  %v356_v56 = vld [vmem:[%s668_s3 + $0x10] sm:$0xff] }
 0x123   :  { %v186_v6 = vsub.f32 %v118_v29, %v170_v61  ;;  %v189_v7 = vsub.f32 %v127_v45, %v173_v62  ;;  %v187_v19 = vsub.f32 %v121_v38, %v171_v11  ;;  %v188_v22 = vsub.f32 %v124_v44, %v172_v14  ;;  %398 = vmatpush.msra.mxu0 %v357_v55 }
 0x124   :  { %v194_v63 = vmul.f32 1.442695, %v184_v57  ;;  %v192_v0 = vmul.f32 1.442695, %v183_v58  ;;  %v190_v2 = vmul.f32 1.442695, %v182_v59 }
 0x125   :  { %v196_v10 = vmul.f32 1.442695, %v185_v5  ;;  %v198_v12 = vmul.f32 1.442695, %v186_v6  ;;  %v204_v16 = vmul.f32 1.442695, %v189_v7  ;;  %399 = vmatpush.msra.mxu0 %v356_v56 }
 0x126   :  { %462 = vpow2.f32 %v194_v63  ;;  %v200_v23 = vmul.f32 1.442695, %v187_v19  ;;  %v202_v24 = vmul.f32 1.442695, %v188_v22  ;;  %v354_v57 = vld [vmem:[%s668_s3] sm:$0xff] }
 0x127   :  { %464 = vpow2.f32 %v192_v0 }
 0x128   :  { %466 = vpow2.f32 %v190_v2 }
 0x129   :  { %468 = vpow2.f32 %v196_v10 }
 0x12a   :  { %470 = vpow2.f32 %v198_v12 }
 0x12b   :  { %472 = vpow2.f32 %v204_v16 }
 0x12c   :  { %v463_v15 = vpop.eup %462  ;;  %474 = vpow2.f32 %v200_v23 }
 0x12d   :  { %v465_v17 = vpop.eup %464  ;;  %221 = vperm.xlu2 %459, %v463_v15   ;;  %476 = vpow2.f32 %v202_v24 }
 0x12e   :  { %v467_v18 = vpop.eup %466  ;;  %218 = vperm.xlu1 %458, %v465_v17  }
 0x12f   :  { %215 = vperm.xlu0 %457, %v467_v18   ;;  %v469_v25 = vpop.eup %468 }
 0x130   :  { %v471_v26 = vpop.eup %470 }
 0x131   :  { %v473_v27 = vpop.eup %472 }
 0x132   :  { %v475_v28 = vpop.eup %474 }
 0x133   :  { %v477_v29 = vpop.eup %476 }
 0x135   :  { %224 = vperm.xlu2 %459, %v469_v25  }
 0x136   :  { %227 = vperm.xlu1 %458, %v471_v26  }
 0x137   :  { %236 = vperm.xlu0 %457, %v473_v27  }
 0x13d   :  { %230 = vperm.xlu2 %459, %v475_v28  }
 0x13e   :  { %233 = vperm.xlu1 %458, %v477_v29  }
 0x187   :  { %v222_v31 = vpop.permute.xlu2 %221 }
 0x188   :  { %v240_v39 = vperm.slane %v222_v31, %v589_v30  ;;  %v267_v58 = vmul.f32 %v222_v31, %v559_v3 }
 0x18a   :  { %v287_v0 = vsel %vm103_vm0, %v267_v58, 0.0 }
 0x18b   :  { %v288_v7 = vrot.slane %v287_v0, 4 }
 0x18d   :  { %v289_v16 = vadd.f32 %v288_v7, %v287_v0 }
 0x18f   :  { %v225_v34 = vpop.permute.xlu2 %224  ;;  %v290_v24 = vrot.slane %v289_v16, 2 }
 0x190   :  { %v241_v42 = vperm.slane %v225_v34, %v589_v30  ;;  %v268_v59 = vmul.f32 %v225_v34, %v568_v9 }
 0x192   :  { %v294_v2 = vsel %vm103_vm0, %v268_v59, 0.0 }
 0x197   :  { %v231_v43 = vpop.permute.xlu2 %230 }
 0x198   :  { %v243_v47 = vperm.slane %v231_v43, %v589_v30  ;;  %v270_v60 = vmul.f32 %v231_v43, %v573_v13  ;;  %v295_v13 = vrot.slane %v294_v2, 4 }
 0x19a   :  { %v308_v5 = vsel %vm103_vm0, %v270_v60, 0.0  ;;  %v296_v17 = vadd.f32 %v295_v13, %v294_v2 }
 0x19b   :  { %v309_v10 = vrot.slane %v308_v5, 4 }
 0x19c   :  { %v297_v25 = vrot.slane %v296_v17, 2 }
 0x19d   :  { %v310_v18 = vadd.f32 %v309_v10, %v308_v5 }
 0x19e   :  { %v298_v34 = vadd.f32 %v297_v25, %v296_v17  ;;  %v461_v25 = vld [vmem:[%s669_s4] ss:$0 sm:$0xff] }
 0x19f   :  { %v311_v26 = vrot.slane %v310_v18, 2 }
 0x1a0   :  { %v219_v32 = vpop.permute.xlu1 %218  ;;  %v299_v43 = vrot.slane %v298_v34, 1 }
 0x1a1   :  { %v216_v33 = vpop.permute.xlu0 %215  ;;  %v239_v35 = vperm.slane %v219_v32, %v589_v30  ;;  %v266_v61 = vmul.f32 %v219_v32, %v566_v8 }
 0x1a2   :  { %v238_v36 = vperm.slane %v216_v33, %v589_v30  ;;  %v265_v62 = vmul.f32 %v216_v33, %v554_v1  ;;  %v291_v33 = vadd.f32 %v290_v24, %v289_v16 }
 0x1a3   :  { %v280_v6 = vsel %vm103_vm0, %v266_v61, 0.0 }
 0x1a4   :  { %v246_v37 = vsel %vm146_vm1, %v239_v35, %v238_v36  ;;  %v273_v8 = vsel %vm103_vm0, %v265_v62, 0.0  ;;  %v312_v35 = vadd.f32 %v311_v26, %v310_v18 }
 0x1a5   :  { %v247_v40 = vsel %vm148_vm2, %v240_v39, %v246_v37  ;;  %v274_v14 = vrot.slane %v273_v8, 4 }
 0x1a6   :  { %v248_v44 = vsel %vm150_vm3, %v241_v42, %v247_v40  ;;  %v292_v42 = vrot.slane %v291_v33, 1 }
 0x1a7   :  { %v275_v22 = vadd.f32 %v274_v14, %v273_v8 }
 0x1a8   :  { %v228_v38 = vpop.permute.xlu1 %227 }
 0x1a9   :  { %v242_v41 = vperm.slane %v228_v38, %v589_v30  ;;  %v237_v46 = vpop.permute.xlu0 %236  ;;  %v269_v63 = vmul.f32 %v228_v38, %v561_v4  ;;  %v281_v4 = vrot.slane %v280_v6, 4  ;;  %v276_v31 = vrot.slane %v275_v22, 2 }
 0x1aa   :  { %v245_v50 = vperm.slane %v237_v46, %v589_v30  ;;  %v272_v3 = vmul.f32 %v237_v46, %v583_v21 }
 0x1ab   :  { %v249_v45 = vsel %vm152_vm4, %v242_v41, %v248_v44  ;;  %v301_v1 = vsel %vm103_vm0, %v269_v63, 0.0  ;;  %v282_v21 = vadd.f32 %v281_v4, %v280_v6  ;;  %v277_v40 = vadd.f32 %v276_v31, %v275_v22 }
 0x1ac   :  { %v250_v51 = vsel %vm154_vm5, %v243_v47, %v249_v45  ;;  %v322_v11 = vsel %vm103_vm0, %v272_v3, 0.0  ;;  %v302_v15 = vrot.slane %v301_v1, 4  ;;  %v313_v44 = vrot.slane %v312_v35, 1 }
 0x1ad   :  { %v323_v19 = vrot.slane %v322_v11, 4  ;;  %v283_v27 = vrot.slane %v282_v21, 2 }
 0x1ae   :  { %v303_v23 = vadd.f32 %v302_v15, %v301_v1 }
 0x1af   :  { %v324_v28 = vadd.f32 %v323_v19, %v322_v11  ;;  %v284_v36 = vadd.f32 %v283_v27, %v282_v21 }
 0x1b0   :  { %v234_v48 = vpop.permute.xlu1 %233  ;;  %v304_v32 = vrot.slane %v303_v23, 2 }
 0x1b1   :  { %v244_v49 = vperm.slane %v234_v48, %v589_v30  ;;  %v355_v30 = vld [vmem:[%s668_s3 + $0x8] sm:$0xff]  ;;  %v271_v9 = vmul.f32 %v234_v48, %v581_v20  ;;  %v325_v37 = vrot.slane %v324_v28, 2  ;;  %v285_v45 = vrot.slane %v284_v36, 1 }
 0x1b2   :  { %400 = vmatpush.msra.mxu0 %v355_v30  ;;  %v305_v41 = vadd.f32 %v304_v32, %v303_v23  ;;  %v278_v48 = vrot.slane %v277_v40, 1 }
 0x1b3   :  { %v251_v52 = vsel %vm156_vm6, %v244_v49, %v250_v51  ;;  %v315_v12 = vsel %vm103_vm0, %v271_v9, 0.0  ;;  %v326_v46 = vadd.f32 %v325_v37, %v324_v28  ;;  %v300_v51 = vadd.f32 %v299_v43, %v298_v34 }
 0x1b4   :  { %v252_v53 = vsel %vm158_vm7, %v245_v50, %v251_v52  ;;  %401 = vmatpush.msra.mxu0 %v354_v57  ;;  %v316_v20 = vrot.slane %v315_v12, 4  ;;  %v306_v49 = vrot.slane %v305_v41, 1  ;;  %v293_v50 = vadd.f32 %v292_v42, %v291_v33 }
 0x1b5   :  { %v254_v54 = vsel %vm161_vm8, %v252_v53, 0.0  ;;  %v314_v53 = vadd.f32 %v313_v44, %v312_v35  ;;  %v327_v55 = vrot.slane %v326_v46, 1  ;;  %v279_v60 = vadd.f32 %v278_v48, %v277_v40 }
 0x1b6   :  { %255 = vadd.xlane.f32.xlu2 %v254_v54  ;;  %v317_v29 = vadd.f32 %v316_v20, %v315_v12  ;;  %v286_v54 = vadd.f32 %v285_v45, %v284_v36  ;;  %v307_v61 = vadd.f32 %v306_v49, %v305_v41 }
 0x1b7   :  { %v328_v3 = vadd.f32 %v327_v55, %v326_v46 }
 0x1b8   :  { %v318_v38 = vrot.slane %v317_v29, 2 }
 0x1ba   :  { %v319_v47 = vadd.f32 %v318_v38, %v317_v29 }
 0x1bc   :  { %v320_v56 = vrot.slane %v319_v47, 1 }
 0x1be   :  { %v321_v9 = vadd.f32 %v320_v56, %v319_v47 }
 0x229   :  { %v256_v39 = vpop.xlane.xlu2 %255 }
 0x22a   :  { %478 = vrcp.f32 %v256_v39 }
 0x230   :  { %v479_v52 = vpop.eup %478 }
 0x231   :  { %v331_v30 = vrot.slane %v479_v52, 1  ;;  %v332_v57 = vrot.slane %v479_v52, 2  ;;  %v333_v58 = vrot.slane %v479_v52, 3  ;;  %v334_v59 = vrot.slane %v479_v52, 4 }
 0x232   :  { %v335_v62 = vrot.slane %v479_v52, 5  ;;  %v336_v63 = vrot.slane %v479_v52, 6  ;;  %v337_v0 = vrot.slane %v479_v52, 7  ;;  %v346_v13 = vmul.f32 %v479_v52, %v279_v60 }
 0x233   :  { %v347_v2 = vmul.f32 %v331_v30, %v286_v54  ;;  %v348_v5 = vmul.f32 %v332_v57, %v293_v50  ;;  %v349_v6 = vmul.f32 %v333_v58, %v300_v51  ;;  %v350_v7 = vmul.f32 %v334_v59, %v307_v61 }
 0x234   :  { %v351_v8 = vmul.f32 %v335_v62, %v314_v53  ;;  %v352_v4 = vmul.f32 %v336_v63, %v321_v9  ;;  %v353_v11 = vmul.f32 %v337_v0, %v328_v3 }
 0x235   :  { %v370_v1 = vrot.slane %v347_v2, 7  ;;  %v372_v10 = vrot.slane %v348_v5, 6  ;;  %v374_v14 = vrot.slane %v349_v6, 5  ;;  %v376_v16 = vrot.slane %v350_v7, 4 }
 0x236   :  { %v378_v18 = vrot.slane %v351_v8, 3  ;;  %v380_v19 = vrot.slane %v352_v4, 2  ;;  %v382_v22 = vrot.slane %v353_v11, 1 }
 0x237   :  { %v371_v12 = vsel %vm146_vm1, %v370_v1, %v346_v13 }
 0x238   :  { %v373_v15 = vsel %vm148_vm2, %v372_v10, %v371_v12 }
 0x239   :  { %v375_v17 = vsel %vm150_vm3, %v374_v14, %v373_v15 }
 0x23a   :  { %v377_v21 = vsel %vm152_vm4, %v376_v16, %v375_v17 }
 0x23b   :  { %v379_v20 = vsel %vm154_vm5, %v378_v18, %v377_v21 }
 0x23c   :  { %v381_v23 = vsel %vm156_vm6, %v380_v19, %v379_v20 }
 0x23d   :  { %v383_v24 = vsel %vm158_vm7, %v382_v22, %v381_v23 }
 0x23e   :  { %434 = vmatmul.msk.f32.vlgmr.msra.gmra.mxu0 %vm103_vm0, %v383_v24 }
 0x2bb   :  { %v403_v26 = vpop.f32.mrf.mxu0 }
 0x2bc   :  { %v404_v27 = vadd.f32 %v461_v25, %v403_v26 }
 0x2be   :  { %406 = vst [vmem:[%s670_s5] sm:$0xff] %v404_v27 }
 0x2bf   :  { %411 = vsyncmov [#allocation3] }
 0x2c2   :  { %s412_s14 = vpop.sfrf %411 }
 0x2c3   :  { %p435_p3 = scmp.ne.s32.totalorder %s412_s14, 0 }
 0x2c5   :  { %416 = shalt.err (%p435_p3)  }

</bundles_post_ra>
